<compile_context>
chip_gen: v5e
topology: v5e:2x2
jax: 0.10.0
libtpu: 0.0.40
codegen_flags: <defaults>
</compile_context>

<pallas_src>
import jax
import jax.numpy as jnp
from jax.experimental import pallas as pl
from jax.experimental.pallas import tpu as pltpu

IN_DIM = 28 * 28      # 784
H1 = 128
H2 = 64
OUT_DIM = 10
OUT_PAD = 128          # lane-dense padded logits width


def _mlp_kernel(x_ref, w1_ref, b1_ref, w2_ref, b2_ref, w3_ref, b3_ref, out_ref):
    # x tile arrives in its native dtype (f32); cast to bf16 in-kernel.
    x = x_ref[...].astype(jnp.bfloat16)
    h1 = jnp.dot(x, w1_ref[...], preferred_element_type=jnp.float32) + b1_ref[...]
    h1 = jnp.maximum(h1, 0.0).astype(jnp.bfloat16)                       # ReLU
    h2 = jnp.dot(h1, w2_ref[...], preferred_element_type=jnp.float32) + b2_ref[...]
    h2 = jnp.maximum(h2, 0.0).astype(jnp.bfloat16)                       # ReLU
    h3 = jnp.dot(h2, w3_ref[...], preferred_element_type=jnp.float32) + b3_ref[...]
    out_ref[...] = h3.astype(out_ref.dtype)                              # (tb, 128) bf16


def _round_up(n, m):
    return ((n + m - 1) // m) * m


def simple_fcnn_forward(x, params, *, tile_b=1024):
    """x: (B, 1, 28, 28) or (B, 784), any float dtype. Returns logits (B, 10) f32."""
    w1, b1, w2, b2, w3, b3 = params

    x2d = x.reshape(-1, IN_DIM)           # native dtype; no wrapper cast / pad
    B = x2d.shape[0]
    x_bytes = x2d.dtype.itemsize

    # Tile size: multiple of 16 (bf16 output sublane packing), <= tile_b.
    # Ragged last tile handled by Pallas (grid = cdiv); no batch padding.
    tb = min(tile_b, _round_up(B, 16))
    grid = (pl.cdiv(B, tb),)
    # TODO(synk): on v7x with tiny batches (grid == 1) one TensorCore idles;
    # nothing to split for the small demo batch here.

    # Resident weights in bf16; biases f32. Pad layer-3 to 128 lanes.
    w1_bf = w1.astype(jnp.bfloat16)
    w2_bf = w2.astype(jnp.bfloat16)
    w3_bf = jnp.pad(w3, ((0, 0), (0, OUT_PAD - OUT_DIM))).astype(jnp.bfloat16)
    b1_f = b1.astype(jnp.float32)
    b2_f = b2.astype(jnp.float32)
    b3_f = jnp.pad(b3, ((0, 0), (0, OUT_PAD - OUT_DIM))).astype(jnp.float32)

    def _const_spec(shape):
        # Full-array block, constant index_map -> DMA'd once, VMEM-resident.
        return pl.BlockSpec(shape, lambda i: (0, 0))

    flops = 2 * B * (IN_DIM * H1 + H1 * H2 + H2 * OUT_PAD)
    weight_bytes = (IN_DIM * H1 + H1 * H2 + H2 * OUT_PAD) * 2 + (H1 + H2 + OUT_PAD) * 4
    bytes_accessed = B * IN_DIM * x_bytes + B * OUT_PAD * 2 + weight_bytes

    out_padded = pl.pallas_call(
        _mlp_kernel,
        out_shape=jax.ShapeDtypeStruct((B, OUT_PAD), jnp.bfloat16),
        grid=grid,
        in_specs=[
            pl.BlockSpec((tb, IN_DIM), lambda i: (i, 0)),       # x: streamed per tile
            _const_spec((IN_DIM, H1)),                          # w1 resident
            _const_spec((1, H1)),                               # b1 resident
            _const_spec((H1, H2)),                              # w2 resident
            _const_spec((1, H2)),                               # b2 resident
            _const_spec((H2, OUT_PAD)),                         # w3 (padded) resident
            _const_spec((1, OUT_PAD)),                          # b3 (padded) resident
        ],
        out_specs=pl.BlockSpec((tb, OUT_PAD), lambda i: (i, 0)),
        compiler_params=pltpu.CompilerParams(
            dimension_semantics=("parallel",),
            vmem_limit_bytes=48 * 1024 * 1024,
        ),
        cost_estimate=pl.CostEstimate(
            flops=flops, bytes_accessed=bytes_accessed, transcendentals=0,
        ),
    )(x2d, w1_bf, b1_f, w2_bf, b2_f, w3_bf, b3_f)

    # Single fused slice + cast back to f32 logits.
    return out_padded[:B, :OUT_DIM].astype(jnp.float32)


def init_params(key):
    """Init matching nn.Linear default (U(-1/sqrt(fan_in), +1/sqrt(fan_in))).

    Weights stored as (in, out) so the kernel computes y = x @ W + b directly.
    Biases stored as (1, out) for clean in-kernel broadcast.
    """
    dims = [(IN_DIM, H1), (H1, H2), (H2, OUT_DIM)]
    params = []
    for (fan_in, fan_out) in dims:
        key, kw, kb = jax.random.split(key, 3)
        bound = 1.0 / jnp.sqrt(jnp.float32(fan_in))
        w = jax.random.uniform(kw, (fan_in, fan_out), jnp.float32, -bound, bound)
        b = jax.random.uniform(kb, (1, fan_out), jnp.float32, -bound, bound)
        params.extend([w, b])
    return tuple(params)


def _reference_forward(x, params):
    """Plain-JAX reference mimicking the kernel's bf16/f32 recipe (incl. bf16 store)."""
    w1, b1, w2, b2, w3, b3 = params
    x2d = x.reshape(-1, IN_DIM).astype(jnp.bfloat16)
    h1 = jnp.dot(x2d, w1.astype(jnp.bfloat16),
                 preferred_element_type=jnp.float32) + b1
    h1 = jnp.maximum(h1, 0.0).astype(jnp.bfloat16)
    h2 = jnp.dot(h1, w2.astype(jnp.bfloat16),
                 preferred_element_type=jnp.float32) + b2
    h2 = jnp.maximum(h2, 0.0).astype(jnp.bfloat16)
    h3 = jnp.dot(h2, w3.astype(jnp.bfloat16),
                 preferred_element_type=jnp.float32) + b3
    return h3.astype(jnp.bfloat16).astype(jnp.float32)


if __name__ == "__main__":
    key = jax.random.PRNGKey(0)
    key, kx = jax.random.split(key)

    params = init_params(key)

    # Small MNIST-like batch: NCHW (2, 1, 28, 28).
    x = jax.random.normal(kx, (2, 1, 28, 28), jnp.float32)

    fwd = jax.jit(simple_fcnn_forward)
    logits = fwd(x, params)
    jax.block_until_ready(logits)

    assert logits.shape == (2, OUT_DIM)
    assert logits.dtype == jnp.float32

    # Cross-check against a plain-JAX reference using the same bf16/f32 recipe.
    ref_bf16 = _reference_forward(x, params)
    assert jnp.allclose(logits, ref_bf16, atol=1e-2, rtol=1e-2)

    # Loose sanity check against the full-f32 reference (bf16 rounding only).
    w1, b1, w2, b2, w3, b3 = params
    x2d = x.reshape(-1, IN_DIM)
    ref_f32 = jnp.maximum(x2d @ w1 + b1, 0.0)
    ref_f32 = jnp.maximum(ref_f32 @ w2 + b2, 0.0)
    ref_f32 = ref_f32 @ w3 + b3
    assert jnp.allclose(logits, ref_f32, atol=5e-2, rtol=5e-2)

    print("KERNEL_OK")
</pallas_src>

<mosaic_0001>
module attributes {stable_mosaic.version = 11 : i64} {
  func.func @_mlp_kernel(%arg0: i32, %arg1: memref<16x784xf32, #tpu.memory_space<vmem>>, %arg2: memref<784x128xbf16, #tpu.memory_space<vmem>>, %arg3: memref<1x128xf32, #tpu.memory_space<vmem>>, %arg4: memref<128x64xbf16, #tpu.memory_space<vmem>>, %arg5: memref<1x64xf32, #tpu.memory_space<vmem>>, %arg6: memref<64x128xbf16, #tpu.memory_space<vmem>>, %arg7: memref<1x128xf32, #tpu.memory_space<vmem>>, %arg8: memref<16x128xbf16, #tpu.memory_space<vmem>>) attributes {dimension_semantics = [#tpu.dimension_semantics<parallel>], iteration_bounds = array<i64: 1>, scalar_prefetch = 0 : i64, scratch_operands = 0 : i64, tpu.core_type = #tpu.core_type<tc>, window_params = [{transform_indices = @transform_0, window_bounds = array<i64: 16, 784>}, {pipeline_mode = #tpu.pipeline_mode<synchronous>, transform_indices = @transform_1, window_bounds = array<i64: 784, 128>}, {pipeline_mode = #tpu.pipeline_mode<synchronous>, transform_indices = @transform_2, window_bounds = array<i64: 1, 128>}, {pipeline_mode = #tpu.pipeline_mode<synchronous>, transform_indices = @transform_3, window_bounds = array<i64: 128, 64>}, {pipeline_mode = #tpu.pipeline_mode<synchronous>, transform_indices = @transform_4, window_bounds = array<i64: 1, 64>}, {pipeline_mode = #tpu.pipeline_mode<synchronous>, transform_indices = @transform_5, window_bounds = array<i64: 64, 128>}, {pipeline_mode = #tpu.pipeline_mode<synchronous>, transform_indices = @transform_6, window_bounds = array<i64: 1, 128>}, {transform_indices = @transform_7, window_bounds = array<i64: 16, 128>}]} {
    %c0 = arith.constant 0 : index
    %c0_0 = arith.constant 0 : index
    %0 = vector.load %arg1[%c0, %c0_0] : memref<16x784xf32, #tpu.memory_space<vmem>>, vector<16x784xf32>
    %1 = arith.truncf %0 : vector<16x784xf32> to vector<16x784xbf16>
    %c0_1 = arith.constant 0 : index
    %c0_2 = arith.constant 0 : index
    %2 = vector.load %arg2[%c0_1, %c0_2] : memref<784x128xbf16, #tpu.memory_space<vmem>>, vector<784x128xbf16>
    %cst = arith.constant dense<0.000000e+00> : vector<16x128xf32>
    %3 = tpu.matmul %1, %2, %cst {dimension_numbers = #tpu.dot_dimension_numbers<[1], [0], [0], [1], [0, 0, 1, 1], [], []>} : vector<16x784xbf16>, vector<784x128xbf16>, vector<16x128xf32> -> vector<16x128xf32>
    %c0_3 = arith.constant 0 : index
    %c0_4 = arith.constant 0 : index
    %4 = vector.load %arg3[%c0_3, %c0_4] : memref<1x128xf32, #tpu.memory_space<vmem>>, vector<1x128xf32>
    %5 = vector.broadcast %4 : vector<1x128xf32> to vector<16x128xf32>
    %6 = arith.addf %3, %5 : vector<16x128xf32>
    %cst_5 = arith.constant 0.000000e+00 : f32
    %7 = vector.broadcast %cst_5 : f32 to vector<16x128xf32>
    %8 = arith.maximumf %6, %7 : vector<16x128xf32>
    %9 = arith.truncf %8 : vector<16x128xf32> to vector<16x128xbf16>
    %c0_6 = arith.constant 0 : index
    %c0_7 = arith.constant 0 : index
    %10 = vector.load %arg4[%c0_6, %c0_7] : memref<128x64xbf16, #tpu.memory_space<vmem>>, vector<128x64xbf16>
    %cst_8 = arith.constant dense<0.000000e+00> : vector<16x64xf32>
    %11 = tpu.matmul %9, %10, %cst_8 {dimension_numbers = #tpu.dot_dimension_numbers<[1], [0], [0], [1], [0, 0, 1, 1], [], []>} : vector<16x128xbf16>, vector<128x64xbf16>, vector<16x64xf32> -> vector<16x64xf32>
    %c0_9 = arith.constant 0 : index
    %c0_10 = arith.constant 0 : index
    %12 = vector.load %arg5[%c0_9, %c0_10] : memref<1x64xf32, #tpu.memory_space<vmem>>, vector<1x64xf32>
    %13 = vector.broadcast %12 : vector<1x64xf32> to vector<16x64xf32>
    %14 = arith.addf %11, %13 : vector<16x64xf32>
    %cst_11 = arith.constant 0.000000e+00 : f32
    %15 = vector.broadcast %cst_11 : f32 to vector<16x64xf32>
    %16 = arith.maximumf %14, %15 : vector<16x64xf32>
    %17 = arith.truncf %16 : vector<16x64xf32> to vector<16x64xbf16>
    %c0_12 = arith.constant 0 : index
    %c0_13 = arith.constant 0 : index
    %18 = vector.load %arg6[%c0_12, %c0_13] : memref<64x128xbf16, #tpu.memory_space<vmem>>, vector<64x128xbf16>
    %cst_14 = arith.constant dense<0.000000e+00> : vector<16x128xf32>
    %19 = tpu.matmul %17, %18, %cst_14 {dimension_numbers = #tpu.dot_dimension_numbers<[1], [0], [0], [1], [0, 0, 1, 1], [], []>} : vector<16x64xbf16>, vector<64x128xbf16>, vector<16x128xf32> -> vector<16x128xf32>
    %c0_15 = arith.constant 0 : index
    %c0_16 = arith.constant 0 : index
    %20 = vector.load %arg7[%c0_15, %c0_16] : memref<1x128xf32, #tpu.memory_space<vmem>>, vector<1x128xf32>
    %21 = vector.broadcast %20 : vector<1x128xf32> to vector<16x128xf32>
    %22 = arith.addf %19, %21 : vector<16x128xf32>
    %23 = arith.truncf %22 : vector<16x128xf32> to vector<16x128xbf16>
    %c0_17 = arith.constant 0 : index
    %c0_18 = arith.constant 0 : index
    %24 = vector.load %arg8[%c0_17, %c0_18] : memref<16x128xbf16, #tpu.memory_space<vmem>>, vector<16x128xbf16>
    tpu.vector_store %arg8[%c0_17, %c0_18], %23 {strides = array<i32>} : memref<16x128xbf16, #tpu.memory_space<vmem>>, vector<16x128xbf16>,
    return
  }
  func.func @transform_0(%arg0: i32) -> (i32, i32) {
    %c0_i32 = arith.constant 0 : i32
    %c0_i32_0 = arith.constant 0 : i32
    return %arg0, %c0_i32 : i32, i32
  }
  func.func @transform_1(%arg0: i32) -> (i32, i32) {
    %c0_i32 = arith.constant 0 : i32
    %c0_i32_0 = arith.constant 0 : i32
    %c0_i32_1 = arith.constant 0 : i32
    return %c0_i32, %c0_i32_0 : i32, i32
  }
  func.func @transform_2(%arg0: i32) -> (i32, i32) {
    %c0_i32 = arith.constant 0 : i32
    %c0_i32_0 = arith.constant 0 : i32
    %c0_i32_1 = arith.constant 0 : i32
    return %c0_i32, %c0_i32_0 : i32, i32
  }
  func.func @transform_3(%arg0: i32) -> (i32, i32) {
    %c0_i32 = arith.constant 0 : i32
    %c0_i32_0 = arith.constant 0 : i32
    %c0_i32_1 = arith.constant 0 : i32
    return %c0_i32, %c0_i32_0 : i32, i32
  }
  func.func @transform_4(%arg0: i32) -> (i32, i32) {
    %c0_i32 = arith.constant 0 : i32
    %c0_i32_0 = arith.constant 0 : i32
    %c0_i32_1 = arith.constant 0 : i32
    return %c0_i32, %c0_i32_0 : i32, i32
  }
  func.func @transform_5(%arg0: i32) -> (i32, i32) {
    %c0_i32 = arith.constant 0 : i32
    %c0_i32_0 = arith.constant 0 : i32
    %c0_i32_1 = arith.constant 0 : i32
    return %c0_i32, %c0_i32_0 : i32, i32
  }
  func.func @transform_6(%arg0: i32) -> (i32, i32) {
    %c0_i32 = arith.constant 0 : i32
    %c0_i32_0 = arith.constant 0 : i32
    %c0_i32_1 = arith.constant 0 : i32
    return %c0_i32, %c0_i32_0 : i32, i32
  }
  func.func @transform_7(%arg0: i32) -> (i32, i32) {
    %c0_i32 = arith.constant 0 : i32
    %c0_i32_0 = arith.constant 0 : i32
    return %arg0, %c0_i32 : i32, i32
  }
}

</mosaic_0001>

<bundles_post_ra>
// kernel: simple_fcnn_forward.1
= control target key start
LH: loop header
LB: loop body
LE: loop exit
PB: predicated region body
PF: predicated region fallthrough
CT: control target
= control target key end

     0   :  { %vm513_vm0 = vcmask 130048   ;;  %vm739_vm1 = vcmask 523264   ;;  %vm763_vm2 = vcmask 1040384   ;;  %s1441_s0 = inlined_call_operand.vmem [shape: f32[2,784], index: 0, kind: input, shape index: {}]   ;;  %s1442_s1 = inlined_call_operand.vmem [shape: bf16[784,128], index: 1, kind: input, shape index: {}]   ;;  %s1443_s2 = inlined_call_operand.vmem [shape: f32[1,128], index: 2, kind: input, shape index: {}]   ;;  %s1444_s3 = inlined_call_operand.vmem [shape: bf16[128,64], index: 3, kind: input, shape index: {}]   ;;  %s1445_s4 = inlined_call_operand.vmem [shape: f32[1,64], index: 4, kind: input, shape index: {}]   ;;  %s1446_s5 = inlined_call_operand.vmem [shape: bf16[64,128], index: 5, kind: input, shape index: {}]   ;;  %s1447_s6 = inlined_call_operand.vmem [shape: f32[1,128], index: 6, kind: input, shape index: {}]   ;;  %s1448_s7 = inlined_call_operand.vmem [shape: bf16[2,128], index: 7, kind: output, shape index: {}]  }
   0x1   :  { %v1101_v0 = vld [vmem:[%s1442_s1 + $0x38] sm:$0xff]  ;;  %v1100_v4 = vld [vmem:[%s1442_s1 + $0x30] sm:$0xff]  ;;  %v1099_v8 = vld [vmem:[%s1442_s1 + $0x28] sm:$0xff] }
   0x2   :  { %v1109_v1 = vld [vmem:[%s1442_s1 + $0x78] sm:$0xff]  ;;  %517 = vmatpush.bf16.msra.mxu0 %v1101_v0  ;;  %v1108_v5 = vld [vmem:[%s1442_s1 + $0x70] sm:$0xff]  ;;  %v1107_v9 = vld [vmem:[%s1442_s1 + $0x68] sm:$0xff] }
   0x3   :  { %v1117_v2 = vld [vmem:[%s1442_s1 + $0xb8] sm:$0xff]  ;;  %531 = vmatpush.bf16.msra.mxu1 %v1109_v1  ;;  %v1116_v6 = vld [vmem:[%s1442_s1 + $0xb0] sm:$0xff]  ;;  %v1115_v10 = vld [vmem:[%s1442_s1 + $0xa8] sm:$0xff] }
   0x4   :  { %v1125_v3 = vld [vmem:[%s1442_s1 + $0xf8] sm:$0xff]  ;;  %545 = vmatpush.bf16.msra.mxu2 %v1117_v2  ;;  %v1124_v7 = vld [vmem:[%s1442_s1 + $0xf0] sm:$0xff]  ;;  %v1123_v11 = vld [vmem:[%s1442_s1 + $0xe8] sm:$0xff] }
   0x5   :  { %559 = vmatpush.bf16.msra.mxu3 %v1125_v3  ;;  %v1098_v12 = vld [vmem:[%s1442_s1 + $0x20] sm:$0xff]  ;;  %v29_v17 = vld [vmem:[%s1441_s0 + $0xe] sm:$0xff]  ;;  %v1097_v20 = vld [vmem:[%s1442_s1 + $0x18] sm:$0xff] }
   0x6   :  { %518 = vmatpush.bf16.msra.mxu0 %v1100_v4  ;;  %v1106_v13 = vld [vmem:[%s1442_s1 + $0x60] sm:$0xff]  ;;  %v33_v19 = vld [vmem:[%s1441_s0 + $0x2a] sm:$0xff]  ;;  %v1105_v21 = vld [vmem:[%s1442_s1 + $0x58] sm:$0xff]  ;;  %61 = vst [vmem:[#allocation1 + $0x1] ss:$4 sm:$0xff] %v29_v17 }
   0x7   :  { %532 = vmatpush.bf16.msra.mxu1 %v1108_v5  ;;  %v1114_v14 = vld [vmem:[%s1442_s1 + $0xa0] sm:$0xff]  ;;  %v1113_v22 = vld [vmem:[%s1442_s1 + $0x98] sm:$0xff]  ;;  %65 = vst [vmem:[#allocation1 + $0x3] ss:$4 sm:$0xff] %v33_v19  ;;  %v28_v24 = vld [vmem:[%s1441_s0 + $0x8] sm:$0x3f] }
   0x8   :  { %546 = vmatpush.bf16.msra.mxu2 %v1116_v6  ;;  %v1122_v15 = vld [vmem:[%s1442_s1 + $0xe0] sm:$0xff]  ;;  %v1121_v23 = vld [vmem:[%s1442_s1 + $0xd8] sm:$0xff]  ;;  %v1096_v25 = vld [vmem:[%s1442_s1 + $0x10] sm:$0xff]  ;;  %67 = vst [vmem:[#allocation1 + $0x20] ss:$4 sm:$0xff] %v28_v24 }
   0x9   :  { %560 = vmatpush.bf16.msra.mxu3 %v1124_v7  ;;  %v27_v16 = vld [vmem:[%s1441_s0] sm:$0xff]  ;;  %v1104_v26 = vld [vmem:[%s1442_s1 + $0x50] sm:$0xff]  ;;  %v1095_v31 = vld [vmem:[%s1442_s1 + $0x8] sm:$0xff] }
   0xa   :  { %519 = vmatpush.bf16.msra.mxu0 %v1099_v8  ;;  %v31_v18 = vld [vmem:[%s1441_s0 + $0x1c] sm:$0xff]  ;;  %59 = vst [vmem:[#allocation1] ss:$4 sm:$0xff] %v27_v16  ;;  %v30_v27 = vld [vmem:[%s1441_s0 + $0x16] sm:$0x3f]  ;;  %v1103_v32 = vld [vmem:[%s1442_s1 + $0x48] sm:$0xff] }
   0xb   :  { %533 = vmatpush.bf16.msra.mxu1 %v1107_v9  ;;  %63 = vst [vmem:[#allocation1 + $0x2] ss:$4 sm:$0xff] %v31_v18  ;;  %v1112_v28 = vld [vmem:[%s1442_s1 + $0x90] sm:$0xff]  ;;  %v32_v30 = vld [vmem:[%s1441_s0 + $0x24] sm:$0x3f]  ;;  %v35_v33 = vld [vmem:[%s1441_s0 + $0x38] sm:$0xff] }
   0xc   :  { %547 = vmatpush.bf16.msra.mxu2 %v1115_v10  ;;  %v1120_v29 = vld [vmem:[%s1442_s1 + $0xd0] sm:$0xff]  ;;  %v1111_v34 = vld [vmem:[%s1442_s1 + $0x88] sm:$0xff]  ;;  %69 = vst [vmem:[#allocation1 + $0x21] ss:$4 sm:$0xff] %v30_v27  ;;  %v1094_v43 = vld [vmem:[%s1442_s1] sm:$0xff] }
   0xd   :  { %561 = vmatpush.bf16.msra.mxu3 %v1123_v11  ;;  %v1119_v35 = vld [vmem:[%s1442_s1 + $0xc8] sm:$0xff]  ;;  %v39_v37 = vld [vmem:[%s1441_s0 + $0x54] sm:$0xff]  ;;  %71 = vst [vmem:[#allocation1 + $0x22] ss:$4 sm:$0xff] %v32_v30  ;;  %v1102_v44 = vld [vmem:[%s1442_s1 + $0x40] sm:$0xff] }
   0xe   :  { %520 = vmatpush.bf16.msra.mxu0 %v1098_v12  ;;  %v37_v36 = vld [vmem:[%s1441_s0 + $0x46] sm:$0xff]  ;;  %v34_v45 = vld [vmem:[%s1441_s0 + $0x32] sm:$0x3f]  ;;  %v1133_v46 = vld [vmem:[%s1442_s1 + $0x138] sm:$0xff] }
   0xf   :  { %534 = vmatpush.bf16.msra.mxu1 %v1106_v13  ;;  %v41_v42 = vld [vmem:[%s1441_s0 + $0x62] sm:$0xff]  ;;  %v1141_v47 = vld [vmem:[%s1442_s1 + $0x178] sm:$0xff]  ;;  %73 = vst [vmem:[#allocation1 + $0x23] ss:$4 sm:$0xff] %v34_v45  ;;  %v1132_v51 = vld [vmem:[%s1442_s1 + $0x130] sm:$0xff] }
  0x10   :  { %548 = vmatpush.bf16.msra.mxu2 %v1114_v14  ;;  %v1110_v48 = vld [vmem:[%s1442_s1 + $0x80] sm:$0xff]  ;;  %v1140_v52 = vld [vmem:[%s1442_s1 + $0x170] sm:$0xff]  ;;  %v1131_v53 = vld [vmem:[%s1442_s1 + $0x128] sm:$0xff] }
  0x11   :  { %562 = vmatpush.bf16.msra.mxu3 %v1122_v15  ;;  %v1118_v49 = vld [vmem:[%s1442_s1 + $0xc0] sm:$0xff]  ;;  %v1139_v54 = vld [vmem:[%s1442_s1 + $0x168] sm:$0xff]  ;;  %v1129_v8 = vld [vmem:[%s1442_s1 + $0x118] sm:$0xff] }
  0x12   :  { %521 = vmatpush.bf16.msra.mxu0 %v1097_v20  ;;  %v74_v38 = vld.sshfl [vmem:[#allocation1] sm:$0xff pattern:$0x73625140]  ;;  %v75_v39 = vld.sshfl [vmem:[#allocation1 + $0x8] sm:$0xff pattern:$0x73625140] }
  0x13   :  { %535 = vmatpush.bf16.msra.mxu1 %v1105_v21  ;;  %v76_v40 = vld.sshfl [vmem:[#allocation1 + $0x10] sm:$0xff pattern:$0x73625140]  ;;  %v77_v41 = vld.sshfl [vmem:[#allocation1 + $0x18] sm:$0xff pattern:$0x73625140] }
  0x14   :  { %549 = vmatpush.bf16.msra.mxu2 %v1113_v22  ;;  %81 = vst [vmem:[#allocation1] ss:$4 sm:$0xff] %v35_v33  ;;  %v1142_v50 = vld [vmem:[%s1442_s1 + $0x180] sm:$0xff]  ;;  %v38_v58 = vld [vmem:[%s1441_s0 + $0x4e] sm:$0x3f]  ;;  %v1137_v9 = vld [vmem:[%s1442_s1 + $0x158] sm:$0xff] }
  0x15   :  { %563 = vmatpush.bf16.msra.mxu3 %v1121_v23  ;;  %82 = vst [vmem:[#allocation1 + $0x1] ss:$4 sm:$0xff] %v37_v36  ;;  %v36_v55 = vld [vmem:[%s1441_s0 + $0x40] sm:$0x3f]  ;;  %v42_v6 = vld [vmem:[%s1441_s0 + $0x6a] sm:$0x3f] }
  0x16   :  { %522 = vmatpush.bf16.msra.mxu0 %v1096_v25  ;;  %83 = vst [vmem:[#allocation1 + $0x2] ss:$4 sm:$0xff] %v39_v37  ;;  %v78_v1 = vld.sshfl [vmem:[#allocation1 + $0x20] sm:$0xff pattern:$0x73625140]  ;;  %v1128_v10 = vld [vmem:[%s1442_s1 + $0x110] sm:$0xff] }
  0x17   :  { %536 = vmatpush.bf16.msra.mxu1 %v1104_v26  ;;  %84 = vst [vmem:[#allocation1 + $0x3] ss:$4 sm:$0xff] %v41_v42  ;;  %v79_v2 = vld.sshfl [vmem:[#allocation1 + $0x28] sm:$0xff pattern:$0x73625140]  ;;  %v1130_v5 = vld [vmem:[%s1442_s1 + $0x120] sm:$0xff] }
  0x18   :  { %550 = vmatpush.bf16.msra.mxu2 %v1112_v28  ;;  %v40_v3 = vld [vmem:[%s1441_s0 + $0x5c] sm:$0x3f]  ;;  %v80_v4 = vld.sshfl [vmem:[#allocation1 + $0x30] sm:$0xff pattern:$0x73625140]  ;;  %v1127_v14 = vld [vmem:[%s1442_s1 + $0x108] sm:$0xff] }
  0x19   :  { %564 = vmatpush.bf16.msra.mxu3 %v1120_v29  ;;  %85 = vst [vmem:[#allocation1 + $0x20] ss:$4 sm:$0xff] %v36_v55  ;;  %v1138_v7 = vld [vmem:[%s1442_s1 + $0x160] sm:$0xff]  ;;  %v1136_v11 = vld [vmem:[%s1442_s1 + $0x150] sm:$0xff]  ;;  %v1135_v15 = vld [vmem:[%s1442_s1 + $0x148] sm:$0xff] }
  0x1a   :  { %523 = vmatpush.bf16.msra.mxu0 %v1095_v31  ;;  %86 = vst [vmem:[#allocation1 + $0x21] ss:$4 sm:$0xff] %v38_v58  ;;  %v1126_v16 = vld [vmem:[%s1442_s1 + $0x100] sm:$0xff]  ;;  %v1150_v22 = vld [vmem:[%s1444_s3 + $0x38] sm:$0xff]  ;;  %v1149_v23 = vld [vmem:[%s1444_s3 + $0x30] sm:$0xff] }
  0x1b   :  { %537 = vmatpush.bf16.msra.mxu1 %v1103_v32  ;;  %87 = vst [vmem:[#allocation1 + $0x22] ss:$4 sm:$0xff] %v40_v3  ;;  %v1134_v18 = vld [vmem:[%s1442_s1 + $0x140] sm:$0xff]  ;;  %v1148_v24 = vld [vmem:[%s1444_s3 + $0x28] sm:$0xff]  ;;  %v1146_v26 = vld [vmem:[%s1444_s3 + $0x18] sm:$0xff] }
  0x1c   :  { %551 = vmatpush.bf16.msra.mxu2 %v1111_v34  ;;  %88 = vst [vmem:[#allocation1 + $0x23] ss:$4 sm:$0xff] %v42_v6  ;;  %v1147_v25 = vld [vmem:[%s1444_s3 + $0x20] sm:$0xff]  ;;  %v1145_v27 = vld [vmem:[%s1444_s3 + $0x10] sm:$0xff]  ;;  %v1144_v28 = vld [vmem:[%s1444_s3 + $0x8] sm:$0xff] }
  0x1d   :  { %565 = vmatpush.bf16.msra.mxu3 %v1119_v35  ;;  %v1143_v32 = vld [vmem:[%s1444_s3] sm:$0xff]  ;;  %v1154_v34 = vld [vmem:[%s1446_s5 + $0x18] sm:$0xff] }
  0x1e   :  { %524 = vmatpush.bf16.msra.mxu0 %v1094_v43  ;;  %v91_v56 = vld.sshfl [vmem:[#allocation1 + $0x10] sm:$0xff pattern:$0x73625140]  ;;  %v89_v57 = vld.sshfl [vmem:[#allocation1] sm:$0xff pattern:$0x73625140] }
  0x1f   :  { %538 = vmatpush.bf16.msra.mxu1 %v1102_v44  ;;  %v112_v59 = vpack.c.bf16 %v91_v56, %v76_v40  ;;  %v110_v60 = vpack.c.bf16 %v89_v57, %v74_v38  ;;  %v92_v61 = vld.sshfl [vmem:[#allocation1 + $0x18] sm:$0xff pattern:$0x73625140]  ;;  %v90_v62 = vld.sshfl [vmem:[#allocation1 + $0x8] sm:$0xff pattern:$0x73625140] }
  0x20   :  { %552 = vmatpush.bf16.msra.mxu2 %v1110_v48  ;;  %v113_v63 = vpack.c.bf16 %v92_v61, %v77_v41  ;;  %v111_v0 = vpack.c.bf16 %v90_v62, %v75_v39  ;;  %v1155_v33 = vld [vmem:[%s1443_s2] ss:$0 sm:$0xff] }
  0x21   :  { %566 = vmatpush.bf16.msra.mxu3 %v1118_v49  ;;  %525 = vmatmul.bf16.vlgmr.msra.gmra.mxu0 %v110_v60  ;;  %v1156_v3 = vld [vmem:[%s1445_s4] ss:$0 sm:$0xff] }
  0x22   :  { %573 = vmatpush.bf16.msrb.mxu0 %v1133_v46  ;;  %539 = vmatmul.bf16.vlgmr.msra.gmra.mxu1 %v111_v0  ;;  %v1152_v0 = vld [vmem:[%s1446_s5 + $0x8] sm:$0xff] }
  0x23   :  { %587 = vmatpush.bf16.msrb.mxu1 %v1141_v47  ;;  %553 = vmatmul.bf16.vlgmr.msra.gmra.mxu2 %v112_v59  ;;  %v95_v12 = vld.sshfl [vmem:[#allocation1 + $0x30] sm:$0xff pattern:$0x73625140]  ;;  %v93_v17 = vld.sshfl [vmem:[#allocation1 + $0x20] sm:$0xff pattern:$0x73625140] }
  0x24   :  { %608 = vmatpush.bf16.msrb.mxu2 %v1142_v50  ;;  %567 = vmatmul.bf16.vlgmr.msra.gmra.mxu3 %v113_v63  ;;  %v116_v13 = vpack.c.bf16 %v95_v12, %v80_v4  ;;  %v94_v19 = vld.sshfl [vmem:[#allocation1 + $0x28] sm:$0xff pattern:$0x73625140]  ;;  %v114_v20 = vpack.c.bf16 %v93_v17, %v78_v1  ;;  %v1153_v63 = vld [vmem:[%s1446_s5 + $0x10] sm:$0xff]  ;;  %v1151_v1 = vld [vmem:[%s1446_s5] sm:$0xff] }
  0x25   :  { %v115_v21 = vpack.c.bf16 %v94_v19, %v79_v2  ;;  %686 = vmatpush.bf16.msrb.mxu3 %v1150_v22 }
  0x26   :  { %574 = vmatpush.bf16.msrb.mxu0 %v1132_v51 }
  0x27   :  { %588 = vmatpush.bf16.msrb.mxu1 %v1140_v52 }
  0x28   :  { %747 = vmatpush.bf16.msra.mxu2 %v1154_v34 }
  0x29   :  { %687 = vmatpush.bf16.msrb.mxu3 %v1149_v23 }
  0x2a   :  { %575 = vmatpush.bf16.msrb.mxu0 %v1131_v53 }
  0x2b   :  { %589 = vmatpush.bf16.msrb.mxu1 %v1139_v54 }
  0x2c   :  { %748 = vmatpush.bf16.msra.mxu2 %v1153_v63 }
  0x2d   :  { %688 = vmatpush.bf16.msrb.mxu3 %v1148_v24 }
  0x2e   :  { %576 = vmatpush.bf16.msrb.mxu0 %v1130_v5 }
  0x2f   :  { %590 = vmatpush.bf16.msrb.mxu1 %v1138_v7 }
  0x30   :  { %749 = vmatpush.bf16.msra.mxu2 %v1152_v0 }
  0x31   :  { %689 = vmatpush.bf16.msrb.mxu3 %v1147_v25 }
  0x32   :  { %577 = vmatpush.bf16.msrb.mxu0 %v1129_v8 }
  0x33   :  { %591 = vmatpush.bf16.msrb.mxu1 %v1137_v9  ;;  %1044 = vmatmul.msk.bf16.vlgmr.msrb.gmra.mxu2 %vm513_vm0, %v116_v13 }
  0x34   :  { %750 = vmatpush.bf16.msra.mxu2 %v1151_v1 }
  0x35   :  { %690 = vmatpush.bf16.msrb.mxu3 %v1146_v26 }
  0x36   :  { %578 = vmatpush.bf16.msrb.mxu0 %v1128_v10  ;;  %v1157_v10 = vld [vmem:[%s1447_s6] ss:$0 sm:$0xff] }
  0x37   :  { %592 = vmatpush.bf16.msrb.mxu1 %v1136_v11 }
  0x39   :  { %691 = vmatpush.bf16.msrb.mxu3 %v1145_v27 }
  0x3a   :  { %579 = vmatpush.bf16.msrb.mxu0 %v1127_v14 }
  0x3b   :  { %593 = vmatpush.bf16.msrb.mxu1 %v1135_v15 }
  0x3d   :  { %692 = vmatpush.bf16.msrb.mxu3 %v1144_v28 }
  0x3e   :  { %580 = vmatpush.bf16.msrb.mxu0 %v1126_v16 }
  0x3f   :  { %594 = vmatpush.bf16.msrb.mxu1 %v1134_v18 }
  0x41   :  { %581 = vmatmul.bf16.vlgmr.msrb.gmra.mxu0 %v114_v20  ;;  %693 = vmatpush.bf16.msrb.mxu3 %v1143_v32 }
  0x42   :  { %595 = vmatmul.bf16.vlgmr.msrb.gmra.mxu1 %v115_v21 }
  0x9e   :  { %v526_v29 = vpop.f32.mrf.mxu0 }
  0x9f   :  { %v540_v31 = vpop.f32.mrf.mxu1  ;;  %v527_v35 = vadd.f32 %v1155_v33, %v526_v29 }
  0xa1   :  { %v541_v38 = vadd.f32 %v540_v31, %v527_v35 }
  0xa6   :  { %v554_v30 = vpop.f32.mrf.mxu2  ;;  %v528_v36 = vpop.f32.mrf.mxu0 }
  0xa7   :  { %v542_v39 = vpop.f32.mrf.mxu1  ;;  %v568_v40 = vpop.f32.mrf.mxu3  ;;  %v529_v41 = vadd.f32 %v1155_v33, %v528_v36  ;;  %v555_v42 = vadd.f32 %v554_v30, %v541_v38 }
  0xa9   :  { %v543_v43 = vadd.f32 %v542_v39, %v529_v41  ;;  %v569_v45 = vadd.f32 %v568_v40, %v555_v42 }
  0xae   :  { %v556_v37 = vpop.f32.mrf.mxu2 }
  0xaf   :  { %v557_v48 = vadd.f32 %v556_v37, %v543_v43  ;;  %v570_v50 = vpop.f32.mrf.mxu3 }
  0xb1   :  { %v571_v51 = vadd.f32 %v570_v50, %v557_v48 }
  0xb6   :  { %v610_v47 = vpop.f32.mrf.mxu2 }
  0xbe   :  { %v582_v44 = vpop.f32.mrf.mxu0  ;;  %v612_v58 = vpop.f32.mrf.mxu2 }
  0xbf   :  { %v596_v46 = vpop.f32.mrf.mxu1  ;;  %v583_v49 = vadd.f32 %v582_v44, %v569_v45 }
  0xc1   :  { %v597_v52 = vadd.f32 %v596_v46, %v583_v49 }
  0xc3   :  { %v611_v56 = vadd.f32 %v610_v47, %v597_v52 }
  0xc5   :  { %v615_v60 = vmax.f32 %v611_v56, 0.0 }
  0xc6   :  { %v584_v53 = vpop.f32.mrf.mxu0 }
  0xc7   :  { %v585_v54 = vadd.f32 %v584_v53, %v571_v51  ;;  %v598_v55 = vpop.f32.mrf.mxu1 }
  0xc9   :  { %v599_v57 = vadd.f32 %v598_v55, %v585_v54 }
  0xcb   :  { %v613_v59 = vadd.f32 %v612_v58, %v599_v57 }
  0xcd   :  { %v616_v61 = vmax.f32 %v613_v59, 0.0 }
  0xcf   :  { %v617_v62 = vpack.c.bf16 %v616_v61, %v615_v60 }
  0xd1   :  { %694 = vmatmul.bf16.vlgmr.msrb.gmra.mxu3 %v617_v62 }
 0x154   :  { %v695_v2 = vpop.f32.mrf.mxu3 }
 0x155   :  { %v696_v4 = vadd.f32 %v1156_v3, %v695_v2 }
 0x157   :  { %v700_v7 = vmax.f32 %v696_v4, 0.0 }
 0x15c   :  { %v697_v5 = vpop.f32.mrf.mxu3 }
 0x15d   :  { %v698_v6 = vadd.f32 %v1156_v3, %v697_v5 }
 0x15f   :  { %v701_v8 = vmax.f32 %v698_v6, 0.0 }
 0x161   :  { %v702_v9 = vpack.c.bf16 %v701_v8, %v700_v7 }
 0x163   :  { %1093 = vmatmul.msk.bf16.vlgmr.msra.gmra.mxu2 %vm739_vm1, %v702_v9 }
 0x1e6   :  { %v752_v11 = vpop.f32.mrf.mxu2 }
 0x1e7   :  { %v753_v12 = vadd.f32 %v1157_v10, %v752_v11 }
 0x1e9   :  { %v757_v13 = vpack.c.bf16 %v753_v12, %v753_v12 }
 0x1eb   :  { %v761_v14 = vrot.slane %v757_v13, 3 }
 0x1ed   :  { %v766_v15 = vsel %vm763_vm2, %v757_v13, %v761_v14 }
 0x1ee   :  { %799 = vst [vmem:[#allocation2] sm:$0x1] %v766_v15  ;;  %v754_v16 = vpop.f32.mrf.mxu2 }
 0x1f5   :  { %v825_v17 = vld [vmem:[#allocation2] sm:$0x1] }
 0x1f6   :  { %826 = vst [vmem:[%s1448_s7] sm:$0x1] %v825_v17 }

</bundles_post_ra>
